<compile_context>
chip_gen: v5e
topology: v5e:2x2
jax: 0.10.0
libtpu: 0.0.40
codegen_flags: <defaults>
</compile_context>

<pallas_src>
import jax
import jax.numpy as jnp
from jax.experimental import pallas as pl
from jax.experimental.pallas import tpu as pltpu

_MIB = 1024 * 1024


def _cdiv(a, b):
    return -(-a // b)


def _vmem_capacity_bytes():
    """Per-TensorCore VMEM capacity; conservative fallback = v7x (64 MiB)."""
    try:
        info = pltpu.get_tpu_info()
        for name in ("vmem_capacity_bytes", "vmem_bytes", "vmem_size_bytes"):
            v = getattr(info, name, None)
            if isinstance(v, int) and v > 0:
                return int(v)
    except Exception:
        pass
    return 64 * _MIB


def _plan_tiles(N, Cin, Cout, HW, x_bytes, o_bytes, blk_budget, x_block_cap):
    """Pick (nb, thw): samples per grid step and lane tile of H*W.

    One block set = x (nb,Cin,thw) + out (nb,Cout,thw) + s (nb,1,Cin); the
    pipeline double-buffers it, so one set must fit in blk_budget and a single
    x block must stay under x_block_cap.
    """
    per_lane = Cin * x_bytes + Cout * o_bytes          # x + out bytes per pixel column
    per_sample_img = HW * per_lane + Cin * 4           # whole-image blocks + s row
    x_img_bytes = Cin * HW * x_bytes

    if per_sample_img <= blk_budget and x_img_bytes <= x_block_cap:
        # Whole images per step; fold as many samples as the budget allows
        # (small-resolution ToRGB layers -> fewer grid steps).
        nb = min(N, blk_budget // per_sample_img, x_block_cap // x_img_bytes)
        nb = max(1, nb)
        thw = HW
    else:
        # One sample per step; tile H*W in lane-aligned (multiple-of-128) chunks.
        nb = 1
        thw = min(blk_budget // per_lane, x_block_cap // (Cin * x_bytes))
        thw = max(128, (thw // 128) * 128)
        thw = min(thw, HW)

    # Expose >= 2 parallel grid steps so both v7x TensorCores get work.
    if _cdiv(N, nb) * _cdiv(HW, thw) < 2:
        if N >= 2:
            nb = _cdiv(N, 2)
        elif HW >= 256:
            thw = min(HW, 128 * _cdiv(_cdiv(HW, 2), 128))
    return int(nb), int(thw)


def _to_rgb_kernel(s_ref, wc_ref, b1_ref, x_ref, o_ref):
    """One grid step: nb samples x thw pixels of the modulated 1x1 conv."""
    xv = x_ref[...]                                       # (nb, Cin, thw), native dtype
    # Per-sample modulated weight (demodulate=False): (Cout,Cin) * (nb,1,Cin).
    wm = (wc_ref[...] * s_ref[...]).astype(xv.dtype)      # (nb, Cout, Cin)
    # Batched MXU matmul, f32 accumulation; thw sits on the 128-lane axis.
    y = jnp.einsum("noc,ncl->nol", wm, xv,
                   preferred_element_type=jnp.float32)    # (nb, Cout, thw) f32
    o_ref[...] = (y + b1_ref[...]).astype(o_ref.dtype)    # + Bias, single store


def to_rgb(x, w_lat, affine_w, affine_b, conv_w, bias1, *,
           out_dtype=None, max_hw_tile=None):
    """ToRGB forward.

    x:        (N, Cin, H, W)    activations (any float dtype; kept native)
    w_lat:    (N, L)            latent vectors
    affine_w: (Cin, L)          nn.Linear weight
    affine_b: (Cin,)            nn.Linear bias
    conv_w:   (Cout, Cin, 1, 1) Conv2dModulated weight (demodulate=False, no conv bias)
    bias1:    (Cout,)           Bias module parameter
    returns:  (N, Cout, H, W) in out_dtype (default: x.dtype)
    """
    N, Cin, H, W = x.shape
    Cout = conv_w.shape[0]
    HW = H * W
    out_dtype = jnp.dtype(x.dtype if out_dtype is None else out_dtype)

    # Tiny per-sample affine as one XLA GEMM: keeps the (L, Cin) operand out of
    # VMEM and avoids recomputing it on every spatial tile.
    s = (w_lat.astype(jnp.float32) @ affine_w.astype(jnp.float32).T
         + affine_b.astype(jnp.float32) + 1.0)                   # (N, Cin)
    s3 = s.reshape(N, 1, Cin)

    x3 = x.reshape(N, Cin, HW)                                    # native dtype, no copy
    wc = conv_w.reshape(Cout, Cin).astype(jnp.float32)
    b1 = bias1.reshape(1, Cout, 1).astype(jnp.float32)

    x_bytes = x3.dtype.itemsize
    o_bytes = out_dtype.itemsize

    # Generation-aware VMEM budget (v5e/v6e: 128 MiB physical, 16/32 MiB scoped
    # default; v7x: 64 MiB per TensorCore).
    cap = _vmem_capacity_bytes()
    if cap >= 128 * _MIB:                      # v5e / v6e
        vmem_limit = 96 * _MIB
        x_block_cap = 24 * _MIB
    else:                                      # v7x (or smaller/unknown parts)
        vmem_limit = max(32 * _MIB, min(cap - 8 * _MIB, (cap * 3) // 4))
        x_block_cap = 8 * _MIB
    blk_budget = vmem_limit // 3               # one block set; x2 for double-buffering

    nb, thw = _plan_tiles(N, Cin, Cout, HW, x_bytes, o_bytes, blk_budget, x_block_cap)
    if max_hw_tile is not None:                # debug/test knob to force spatial tiling
        thw = min(thw, max(128, (int(max_hw_tile) // 128) * 128))

    grid = (_cdiv(N, nb), _cdiv(HW, thw))

    cost = pl.CostEstimate(
        flops=(2 * N * Cout * Cin * HW + N * Cout * HW
               + grid[0] * grid[1] * nb * Cout * Cin),
        transcendentals=0,
        bytes_accessed=(x3.size * x_bytes + N * Cout * HW * o_bytes
                        + 4 * (s3.size + wc.size + b1.size)),
    )

    out = pl.pallas_call(
        _to_rgb_kernel,
        out_shape=jax.ShapeDtypeStruct((N, Cout, HW), out_dtype),
        grid=grid,
        in_specs=[
            pl.BlockSpec((nb, 1, Cin), lambda b, t: (b, 0, 0)),    # s = affine(w)+1
            pl.BlockSpec((Cout, Cin), lambda b, t: (0, 0)),        # shared 1x1 weight
            pl.BlockSpec((1, Cout, 1), lambda b, t: (0, 0, 0)),    # output bias
            pl.BlockSpec((nb, Cin, thw), lambda b, t: (b, 0, t)),  # activations
        ],
        out_specs=pl.BlockSpec((nb, Cout, thw), lambda b, t: (b, 0, t)),
        compiler_params=pltpu.CompilerParams(
            dimension_semantics=("parallel", "parallel"),
            vmem_limit_bytes=int(vmem_limit)),
        cost_estimate=cost,
    )(s3, wc, b1, x3)

    return out.reshape(N, Cout, H, W)


# ---------------- pure-JAX reference (mirrors the PyTorch module) ----------------
def _ref_forward(x, w_lat, affine_w, affine_b, conv_w, bias1):
    N, Cin, H, W = x.shape
    Cout = conv_w.shape[0]
    s = w_lat @ affine_w.T + affine_b + 1.0                      # (N, Cin)
    wm = s[:, None, :, None, None] * conv_w[None]                # (N, Cout, Cin, 1, 1)
    # fused_modconv grouped 1x1 conv, groups = batch
    xg = x.reshape(1, N * Cin, H, W)
    wg = wm.reshape(N * Cout, Cin, 1, 1)
    y = jax.lax.conv_general_dilated(
        xg, wg, window_strides=(1, 1), padding='VALID',
        dimension_numbers=('NCHW', 'OIHW', 'NCHW'),
        feature_group_count=N)
    y = y.reshape(N, Cout, H, W)
    return y + bias1[None, :, None, None]


if __name__ == "__main__":
    key = jax.random.PRNGKey(0)

    def make_inputs(k, N, Cin, Cout, L, H, W, x_dtype):
        ks = jax.random.split(k, 6)
        x = jax.random.normal(ks[0], (N, Cin, H, W), jnp.float32).astype(x_dtype)
        w_lat = jax.random.normal(ks[1], (N, L), jnp.float32)
        affine_w = jax.random.normal(ks[2], (Cin, L), jnp.float32) * 0.3
        affine_b = jax.random.normal(ks[3], (Cin,), jnp.float32) * 0.1
        conv_w = jax.random.normal(ks[4], (Cout, Cin, 1, 1), jnp.float32) * 0.3
        bias1 = jax.random.normal(ks[5], (Cout,), jnp.float32) * 0.1
        return x, w_lat, affine_w, affine_b, conv_w, bias1

    k1, k2 = jax.random.split(key)

    # Case 1: spec shapes, f32, small-resolution batch-fold path (whole image per step).
    args1 = make_inputs(k1, N=2, Cin=4, Cout=3, L=8, H=16, W=16, x_dtype=jnp.float32)
    y1 = jax.block_until_ready(to_rgb(*args1))
    ref1 = _ref_forward(args1[0].astype(jnp.float32), *args1[1:])
    assert y1.shape == (2, 3, 16, 16), y1.shape
    assert jnp.allclose(y1, ref1, atol=1e-3, rtol=1e-3), float(
        jnp.max(jnp.abs(y1 - ref1)))

    # Case 2: native bf16 input, lane-tiled spatial path with a masked ragged tail.
    args2 = make_inputs(k2, N=1, Cin=8, Cout=3, L=8, H=48, W=48, x_dtype=jnp.bfloat16)
    y2 = jax.block_until_ready(to_rgb(*args2, max_hw_tile=512))
    ref2 = _ref_forward(args2[0].astype(jnp.float32), *args2[1:])
    assert y2.shape == (1, 3, 48, 48), y2.shape
    assert jnp.allclose(y2.astype(jnp.float32), ref2, atol=5e-2, rtol=5e-2), float(
        jnp.max(jnp.abs(y2.astype(jnp.float32) - ref2)))

    print("KERNEL_OK")
</pallas_src>

<mosaic_0001>
module attributes {stable_mosaic.version = 11 : i64} {
  func.func @_to_rgb_kernel(%arg0: i32, %arg1: i32, %arg2: memref<1x1x4xf32, #tpu.memory_space<vmem>>, %arg3: memref<3x4xf32, #tpu.memory_space<vmem>>, %arg4: memref<1x3x1xf32, #tpu.memory_space<vmem>>, %arg5: memref<1x4x256xf32, #tpu.memory_space<vmem>>, %arg6: memref<1x3x256xf32, #tpu.memory_space<vmem>>) attributes {dimension_semantics = [#tpu.dimension_semantics<parallel>, #tpu.dimension_semantics<parallel>], iteration_bounds = array<i64: 2, 1>, scalar_prefetch = 0 : i64, scratch_operands = 0 : i64, tpu.core_type = #tpu.core_type<tc>, window_params = [{transform_indices = @transform_0, window_bounds = array<i64: 1, 1, 4>}, {pipeline_mode = #tpu.pipeline_mode<synchronous>, transform_indices = @transform_1, window_bounds = array<i64: 3, 4>}, {pipeline_mode = #tpu.pipeline_mode<synchronous>, transform_indices = @transform_2, window_bounds = array<i64: 1, 3, 1>}, {transform_indices = @transform_3, window_bounds = array<i64: 1, 4, 256>}, {transform_indices = @transform_4, window_bounds = array<i64: 1, 3, 256>}]} {
    %c0 = arith.constant 0 : index
    %c0_0 = arith.constant 0 : index
    %c0_1 = arith.constant 0 : index
    %0 = vector.load %arg5[%c0, %c0_0, %c0_1] : memref<1x4x256xf32, #tpu.memory_space<vmem>>, vector<1x4x256xf32>
    %c0_2 = arith.constant 0 : index
    %c0_3 = arith.constant 0 : index
    %1 = vector.load %arg3[%c0_2, %c0_3] : memref<3x4xf32, #tpu.memory_space<vmem>>, vector<3x4xf32>
    %c0_4 = arith.constant 0 : index
    %c0_5 = arith.constant 0 : index
    %c0_6 = arith.constant 0 : index
    %2 = vector.load %arg2[%c0_4, %c0_5, %c0_6] : memref<1x1x4xf32, #tpu.memory_space<vmem>>, vector<1x1x4xf32>
    %3 = vector.shape_cast %1 : vector<3x4xf32> to vector<1x3x4xf32>
    %4 = vector.broadcast %2 : vector<1x1x4xf32> to vector<1x3x4xf32>
    %5 = arith.mulf %3, %4 : vector<1x3x4xf32>
    "tpu.trace_start"() <{level = 10 : i32, message = "noc,ncl->nol"}> : () -> ()
    %cst = arith.constant dense<0.000000e+00> : vector<1x3x256xf32>
    %6 = tpu.matmul %5, %0, %cst {dimension_numbers = #tpu.dot_dimension_numbers<[2], [1], [1], [2], [0, 0, 0, 1, 1, 2], [0], [0]>} : vector<1x3x4xf32>, vector<1x4x256xf32>, vector<1x3x256xf32> -> vector<1x3x256xf32>
    "tpu.trace_stop"() : () -> ()
    %c0_7 = arith.constant 0 : index
    %c0_8 = arith.constant 0 : index
    %c0_9 = arith.constant 0 : index
    %7 = vector.load %arg4[%c0_7, %c0_8, %c0_9] : memref<1x3x1xf32, #tpu.memory_space<vmem>>, vector<1x3x1xf32>
    %8 = vector.broadcast %7 : vector<1x3x1xf32> to vector<1x3x256xf32>
    %9 = arith.addf %6, %8 : vector<1x3x256xf32>
    %c0_10 = arith.constant 0 : index
    %c0_11 = arith.constant 0 : index
    %c0_12 = arith.constant 0 : index
    %10 = vector.load %arg6[%c0_10, %c0_11, %c0_12] : memref<1x3x256xf32, #tpu.memory_space<vmem>>, vector<1x3x256xf32>
    tpu.vector_store %arg6[%c0_10, %c0_11, %c0_12], %9 {strides = array<i32>} : memref<1x3x256xf32, #tpu.memory_space<vmem>>, vector<1x3x256xf32>,
    return
  }
  func.func @transform_0(%arg0: i32, %arg1: i32) -> (i32, i32, i32) {
    %c0_i32 = arith.constant 0 : i32
    %c0_i32_0 = arith.constant 0 : i32
    %c0_i32_1 = arith.constant 0 : i32
    return %arg0, %c0_i32, %c0_i32_0 : i32, i32, i32
  }
  func.func @transform_1(%arg0: i32, %arg1: i32) -> (i32, i32) {
    %c0_i32 = arith.constant 0 : i32
    %c0_i32_0 = arith.constant 0 : i32
    %c0_i32_1 = arith.constant 0 : i32
    return %c0_i32, %c0_i32_0 : i32, i32
  }
  func.func @transform_2(%arg0: i32, %arg1: i32) -> (i32, i32, i32) {
    %c0_i32 = arith.constant 0 : i32
    %c0_i32_0 = arith.constant 0 : i32
    %c0_i32_1 = arith.constant 0 : i32
    %c0_i32_2 = arith.constant 0 : i32
    return %c0_i32, %c0_i32_0, %c0_i32_1 : i32, i32, i32
  }
  func.func @transform_3(%arg0: i32, %arg1: i32) -> (i32, i32, i32) {
    %c0_i32 = arith.constant 0 : i32
    %c0_i32_0 = arith.constant 0 : i32
    return %arg0, %c0_i32, %arg1 : i32, i32, i32
  }
  func.func @transform_4(%arg0: i32, %arg1: i32) -> (i32, i32, i32) {
    %c0_i32 = arith.constant 0 : i32
    %c0_i32_0 = arith.constant 0 : i32
    return %arg0, %c0_i32, %arg1 : i32, i32, i32
  }
}

</mosaic_0001>

<bundles_post_ra>
// kernel: tpu_custom_call.1
= control target key start
LH: loop header
LB: loop body
LE: loop exit
PB: predicated region body
PF: predicated region fallthrough
CT: control target
= control target key end

     0   :  { %9 = vsyncpa [#allocation3], 0  ;;  %s804_s0 = inlined_call_operand.hbm [shape: f32[2,1,4], index: 0, kind: input, shape index: {}]   ;;  %s805_s1 = inlined_call_operand.vmem [shape: f32[3,4], index: 1, kind: input, shape index: {}]   ;;  %s806_s2 = inlined_call_operand.vmem [shape: f32[1,3,1], index: 2, kind: input, shape index: {}]   ;;  %s807_s3 = inlined_call_operand.hbm [shape: f32[2,4,256], index: 3, kind: input, shape index: {}]   ;;  %s808_s4 = inlined_call_operand.vmem [shape: f32[2,3,256], index: 4, kind: output, shape index: {}]  }
   0x1   :  { %11 = vsyncpa [#allocation3 + $0x1], 0 }
   0x2   :  { %12 = vsyncpa [#allocation5], 0 }
   0x3   :  { %14 = vsyncpa [#allocation5 + $0x1], 0  ;;  %s691_s15 = smov 0   ;;  %s693_s16 = smov 0  }
   0x4   :  { %s695_s17 = smov 0   ;;  %s697_s18 = smov 0  }
   0x5   :  { %s699_s19 = smov 0   ;;  %s701_s20 = smov 0  }
   0x6 LB: > { %s467_s21 = sadd.s32 4294967295, %s663_s20   ;;  %s32_s22 = sadd.s32 1, %s659_s19  ;;  %s663_s20 = sphi %s701_s20, %s20_s20   ;;  %s659_s19 = sphi %s699_s19, %s816_s19   ;;  %s655_s18 = sphi %s697_s18, %s815_s18   ;;  %s651_s17 = sphi %s695_s17, %s814_s17   ;;  %s647_s16 = sphi %s693_s16, %s813_s16   ;;  %s643_s15 = sphi %s691_s15, %s812_s15  }
   0x7   : > { %p34_p0 = scmp.ge.s32.totalorder %s32_s22, 2  ;;  %s39_s23 = sadd.s32 1, %s651_s17 }
   0x8   : > { %p46_p1 = scmp.ne.s32.totalorder %s651_s17, %s647_s16  ;;  %p47_p2 = scmp.eq.s32.totalorder %s663_s20, 0 }
   0x9   : > { %s818_s22 = smov (%p34_p0, %s32_s22), 0  ;;  %p52_p4 = scmp.ne.s32.totalorder %s647_s16, %s643_s15 }
   0xa   : > { %p727_p3 = por %p47_p2, %p46_p1  ;;  %s36_s25 = ssub.s32 %s659_s19, %s818_s22 }
   0xb   : > { %p53_p5 = scmp.eq.s32.totalorder %s467_s21, 0  ;;  %p37_p6 = scmp.eq.s32.totalorder %s36_s25, 0 }
   0xc   : > { %p497_p8 = scmp.lt.s32.totalorder %s663_s20, 2  ;;  %s180_s28 = sand.u32 1, %s651_s17  }
   0xd   : > { %p734_p7 = por %p53_p5, %p52_p4  ;;  %s186_s5 = scalar_lea.hbm %s804_s0, %s659_s19 }
   0xe   : > { %s740_s27 = scalar_select %p37_p6, %s651_s17, %s39_s23  }
   0xf   : > { %s188_s6 = sshll.u32 %s186_s5, 4  ;;  %s183_s7 = scalar_lea.vmem [#allocation2], %s180_s28  ;;  %s189_s6 = int_to_ptr.hbm [resolvable:$true] %s188_s6 }
  0x10   : > { %s190_s8 = sshll.u32 %s183_s7, 4  ;;  %p749_p9 = pnand %p497_p8, %p727_p3  ;;  %s191_s8 = int_to_ptr.vmem [resolvable:$true] %s190_s8 }
  0x11   : > { %p474_p10 = scmp.ge.s32.totalorder %s663_s20, 1  ;;  %p217_p11 = scmp.lt.s32.totalorder %s663_s20, 3 }
  0x12   : > { %s471_s10 = sshll.u32 %s180_s28, 3  ;;  %s181_s11 = scalar_lea.sflag [#allocation3], %s180_s28 }
  0x13   : > { %493 = dma.hbm_to_vmem [thread:$0]  (!%p749_p9), %s189_s6, 16, %s191_s8, %s181_s11  }
  0x14   : > { %p218_p12 = pnand %p474_p10, %p217_p11  ;;  %s484_s12 = sshll.u32 %s659_s19, 3 }
  0x15   : > { %s201_s13 = scalar_lea.vmem [#allocation4], %s471_s10  ;;  %s208_s23 = scalar_lea.hbm %s807_s3, %s484_s12 }
  0x16   : > { %s212_s14 = sshll.u32 %s201_s13, 4  ;;  %s210_s24 = sshll.u32 %s208_s23, 4  ;;  %s213_s14 = int_to_ptr.vmem [resolvable:$true] %s212_s14  ;;  %s211_s24 = int_to_ptr.hbm [resolvable:$true] %s210_s24 }
  0x17   : > { %s198_s25 = scalar_lea.sflag [#allocation5], %s180_s28  ;;  %221 = sbr.rel (%p218_p12) target bundleno = 174 (0xae), region = 36 }
  0x18   : > { %496 = dma.hbm_to_vmem [thread:$0]  (!%p749_p9), %s211_s24, 128, %s213_s14, %s198_s25  }
  0x19   : > { %s223_s29 = sand.u32 (!%p218_p12), 1, %s647_s16  }
  0x1a   : > { %s224_s30 = scalar_lea.sflag (!%p218_p12), [#allocation3], %s223_s29  ;;  %s226_s5 = scalar_lea.vmem (!%p218_p12), [#allocation2], %s223_s29 }
  0x1c   : > { %634 = dma.done.wait (%p734_p7), %s224_s30, 16  }
  0x1d   : > { %636 = vsyncadd (%p734_p7), %s224_s30, 4294967280  ;;  %s475_s6 = sshll.u32 %s223_s29, 3  ;;  %s233_s7 = scalar_lea.sflag [#allocation5], %s223_s29 }
  0x1e   : > { %s236_s8 = scalar_lea.vmem [#allocation4], %s475_s6 }
  0x1f   : > { %638 = dma.done.wait (%p734_p7), %s233_s7, 128  }
  0x20   : > { %640 = vsyncadd (%p734_p7), %s233_s7, 4294967168  ;;  %v665_v0 = vmov 0   ;;  %v281_v1 = vld [vmem:[%s236_s8] sm:$0xff]  ;;  %v288_v2 = vld [vmem:[%s806_s2] sm:$0x7]  ;;  %vm302_vm0 = vcmask 1043456  }
  0x21   : > { %547 = vset.pattern.permute.xlu0 %v665_v0  ;;  %295 = vst [vmem:[#allocation1] ss:$2 sm:$0xff] %v281_v1  ;;  %v548_v3 = vld [vmem:[%s226_s5] ss:$0 sm:$0xff]  ;;  %vm298_vm1 = vcmask 31744   ;;  %p272_p13 = scmp.lt.s32.totalorder %s655_s18, 1 }
  0x22   : > { %291 = vperm.xlu0 %547, %v288_v2   ;;  %v282_v4 = vld [vmem:[%s805_s1] sm:$0x7] }
  0x23   : > { %v287_v5 = vmul.f32 %v548_v3, %v282_v4  ;;  %s820_s18 = smov (!%p272_p13, %s655_s18), 1 }
  0x24   : > { %s485_s26 = sshll.u32 %s820_s18, 3 }
  0x25   : > { %s279_s14 = scalar_lea.vmem %s808_s4, %s485_s26 }
  0x28   : > { %v296_v6 = vld.sshfl [vmem:[#allocation1] sm:$0xff pattern:$0x75316420]  ;;  %v297_v7 = vld.sshfl [vmem:[#allocation1 + $0x8] sm:$0xff pattern:$0x75316420] }
  0x29   : > { %478 = vmatpush.msk.msra.mxu0 %vm302_vm0, %v296_v6  ;;  %480 = vmatpush.msk.msra.mxu1 %vm302_vm0, %v297_v7 }
  0x2a   : > { %479 = vmatmul.msk.f32.vlgmr.msra.gmra.mxu0 %vm298_vm1, %v287_v5  ;;  %481 = vmatmul.msk.f32.vlgmr.msra.gmra.mxu1 %vm298_vm1, %v287_v5 }
  0x94   : > { %v292_v8 = vpop.permute.xlu0 %291 }
  0xa7   : > { %v324_v9 = vpop.f32.mrf.mxu0  ;;  %v344_v10 = vpop.f32.mrf.mxu1 }
  0xa8   : > { %v345_v11 = vadd.f32 %v344_v10, %v292_v8  ;;  %v325_v12 = vadd.f32 %v324_v9, %v292_v8 }
  0xaa   : > { %v349_v13 = vrot.slane %v345_v11, 4 }
  0xac   : > { %v350_v14 = vsel %vm302_vm0, %v325_v12, %v349_v13 }
  0xad   : > { %352 = vst [vmem:[%s279_s14] sm:$0x77] %v350_v14 }
  0xae PF: > { %s20_s20 = sadd.s32 1, %s663_s20   ;;  %s812_s15 = smov %s647_s16 }
  0xaf   : > { %p17_p0 = scmp.ge.s32.totalorder %s20_s20, 4   ;;  %s813_s16 = smov %s651_s17 }
  0xb0   : > { %s814_s17 = smov %s740_s27  ;;  %s815_s18 = smov %s659_s19 }
  0xb1   : > { %s816_s19 = smov %s818_s22  ;;  %19 = sbr.rel (!%p17_p0) target bundleno = 6 (0x6), region = 89 }
  0xb6   :  { %383 = vsyncpa [#allocation3], 1 }
  0xb7   :  { %385 = vsyncpa [#allocation3 + $0x1], 1 }
  0xb8   :  { %386 = vsyncpa [#allocation5], 1 }
  0xb9   :  { %388 = vsyncpa [#allocation5 + $0x1], 1 }

</bundles_post_ra>
